<compile_context>
chip_gen: v7x
topology: tpu7x:2x2x1
jax: 0.10.0
libtpu: 0.0.40
codegen_flags: <defaults>
</compile_context>

<pallas_src>
import math

import jax
import jax.numpy as jnp
import numpy as np
from jax.experimental import pallas as pl
from jax.experimental.pallas import tpu as pltpu


# ------------------------- Fused Pallas kernel -------------------------

def _fused_sage_kernel(side_ref, src_ref, dst_ref, w_ref, b_ref, o_ref):
    # side_ref : (rows, 8)   f32  col0 = tile-relative lo, col1 = span (hi-lo),
    #                             col2 = 1/(dst_deg + 1); other cols unused
    # src_ref  : (rows, dim) f32  edge neighbor features (bucket-contiguous)
    # dst_ref  : (rows, dim) f32  edge self features
    # w_ref    : (2*dim, out_p) f32  concat([W_self^T; W_neigh^T]) (N padded)
    # b_ref    : (1, out_p)  f32  b_self + b_neigh (N padded)
    # o_ref    : (rows, out_p) f32
    rows, dim = src_ref.shape

    lo = side_ref[:, 0:1].astype(jnp.int32)       # (rows, 1) tile-relative lo
    span = side_ref[:, 1:2].astype(jnp.int32)     # (rows, 1) hi - lo (>= 0)
    inv = side_ref[:, 2:3]                        # (rows, 1) 1/(deg+1)

    # Prefix-window membership with a single unsigned range compare:
    #   lo <= c <= hi   <=>   (c - lo) as u32  <=  (hi - lo) as u32
    c = jax.lax.broadcasted_iota(jnp.int32, (rows, rows), 1)
    d = (c - lo).astype(jnp.uint32)
    in_win = d <= span.astype(jnp.uint32)
    # Fold the mean coefficient into the mask (left diagonal commutes).
    mask = jnp.where(in_win, inv, 0.0)
    # TODO(synk): production v6e/v7x should run this matmul in bf16 (keep f32
    #             accumulation); kept f32 here so the 1e-5 rtol check holds.
    h_neigh = jnp.dot(mask, src_ref[...], preferred_element_type=jnp.float32)

    # fc_self + fc_neigh: two dots into one f32 accumulator, no lane concat.
    acc = jnp.dot(dst_ref[...], w_ref[:dim, :],
                  preferred_element_type=jnp.float32)
    acc = acc + jnp.dot(h_neigh, w_ref[dim:, :],
                        preferred_element_type=jnp.float32)
    o_ref[...] = (acc + b_ref[...]).astype(o_ref.dtype)


def _choose_rows_per_tile(E, deg, target_rows=256, min_steps=4):
    """Rows per grid step: bucket-aligned (multiple of deg), sublane-aligned
    (multiple of 8).  Prefer a size that divides E exactly (so the (E, dim)
    arrays never need a jnp.pad HBM copy) and gives >= min_steps grid steps
    (v7x has two TensorCores sharing the 'parallel' grid).  Use target_rows=128
    on v5e (K=256 buys nothing on its 128x128 MXUs)."""
    unit = deg * 8 // math.gcd(deg, 8)            # lcm(deg, 8)
    if E % unit == 0:
        divisors = [r for r in range(unit, E + 1, unit) if E % r == 0]
        good = [r for r in divisors if r <= target_rows and E // r >= min_steps]
        if good:
            return max(good), E
        small = [r for r in divisors if r <= target_rows]
        return (max(small) if small else divisors[0]), E
    # Fallback: E not a multiple of lcm(deg, 8) -> pad (rare; padded rows get
    # inv = 0 so their mask is all-zero and they are sliced off).
    rows = max(unit, (target_rows // unit) * unit)
    e_pad = ((E + rows - 1) // rows) * rows
    return rows, e_pad


def fused_tsage_mean(src_feat, dst_feat, dst_max_eid, dst_deg, deg,
                     w_cat, b_cat, *, target_rows=256):
    """rst = dst_feat @ Ws^T + bs + (prefix_sum_gather(src_feat)/(deg+1)) @ Wn^T + bn."""
    E, dim = src_feat.shape
    two_dim, out = w_cat.shape
    assert two_dim == 2 * dim
    # Modeling assumption (DGL bucketing): every dst bucket is `deg` contiguous
    # time-sorted edges and dst_max_eid resolves inside its own bucket.
    assert E % deg == 0, "edges must form dense buckets of exactly `deg` rows"

    rows, e_pad = _choose_rows_per_tile(E, deg, target_rows)
    grid = e_pad // rows

    # Lane-dense output: pad N to a multiple of 128 (zero weight/bias columns),
    # so output stores are unmasked vst; extra columns are sliced off.
    out_p = ((out + 127) // 128) * 128
    if out_p != out:
        w_cat = jnp.pad(w_cat, ((0, 0), (0, out_p - out)))
        b_cat = jnp.pad(b_cat, ((0, 0), (0, out_p - out)))

    eid = dst_max_eid.astype(jnp.int32)
    lo = (eid // deg) * deg                            # bucket start of target
    span = eid - lo                                    # hi - lo  (>= 0)
    tile_base = (jnp.arange(E, dtype=jnp.int32) // rows) * rows
    lo_rel = lo - tile_base                            # tiles are bucket-aligned
    inv = 1.0 / (dst_deg.astype(jnp.float32) + 1.0)    # multiply, not divide

    # Pack lo_rel / span / inv into ONE (e_pad, 8) side array -> one BlockSpec
    # and one per-step DMA instead of three (rows, 1) blocks.
    side = jnp.zeros((e_pad, 8), jnp.float32)
    side = side.at[:E, 0].set(lo_rel.astype(jnp.float32))
    side = side.at[:E, 1].set(span.astype(jnp.float32))
    side = side.at[:E, 2].set(inv)                     # padded rows: inv = 0

    if e_pad != E:
        srcp = jnp.pad(src_feat, ((0, e_pad - E), (0, 0)))
        dstp = jnp.pad(dst_feat, ((0, e_pad - E), (0, 0)))
    else:
        srcp, dstp = src_feat, dst_feat                # no (E, dim) HBM copies

    flops = grid * (2 * rows * rows * dim + 2 * 2 * rows * dim * out_p)
    bytes_accessed = 4 * (2 * e_pad * dim + e_pad * 8 + 2 * dim * out_p
                          + out_p + e_pad * out_p)

    out_pad = pl.pallas_call(
        _fused_sage_kernel,
        out_shape=jax.ShapeDtypeStruct((e_pad, out_p), jnp.float32),
        grid=(grid,),
        in_specs=[
            pl.BlockSpec((rows, 8), lambda i: (i, 0)),         # lo/span/inv
            pl.BlockSpec((rows, dim), lambda i: (i, 0)),       # src_feat
            pl.BlockSpec((rows, dim), lambda i: (i, 0)),       # dst_feat
            pl.BlockSpec((2 * dim, out_p), lambda i: (0, 0)),  # [Ws^T; Wn^T]
            pl.BlockSpec((1, out_p), lambda i: (0, 0)),        # bs + bn
        ],
        out_specs=pl.BlockSpec((rows, out_p), lambda i: (i, 0)),
        compiler_params=pltpu.CompilerParams(
            dimension_semantics=("parallel",)),
        cost_estimate=pl.CostEstimate(flops=flops, transcendentals=0,
                                      bytes_accessed=bytes_accessed),
    )(side, srcp, dstp, w_cat, b_cat)
    return out_pad[:E, :out]


# ------------------------- Module wrapper -------------------------

class FastTSAGEConvMean:
    """JAX/Pallas port of FastTSAGEConv forward with aggregator_type='mean'."""

    def __init__(self, in_feats, out_feats, key):
        self.in_feats = in_feats
        self.out_feats = out_feats
        k1, k2, k3, k4 = jax.random.split(key, 4)
        gain = float(np.sqrt(2.0))  # calculate_gain('relu')
        bound = gain * float(np.sqrt(6.0 / (in_feats + out_feats)))
        # torch Linear weight is (out, in); store transposed (in, out).
        self.w_self_t = jax.random.uniform(
            k1, (in_feats, out_feats), jnp.float32, -bound, bound)
        self.w_neigh_t = jax.random.uniform(
            k2, (in_feats, out_feats), jnp.float32, -bound, bound)
        bb = 1.0 / float(np.sqrt(in_feats))
        self.b_self = jax.random.uniform(
            k3, (out_feats,), jnp.float32, -bb, bb)
        self.b_neigh = jax.random.uniform(
            k4, (out_feats,), jnp.float32, -bb, bb)
        # Fused parameters (single weight slab / single bias add in the kernel).
        self.w_cat = jnp.concatenate([self.w_self_t, self.w_neigh_t], axis=0)
        self.b_cat = (self.b_self + self.b_neigh).reshape(1, out_feats)

    def __call__(self, src_feat, dst_feat, dst_max_eid, dst_deg, buc, deg):
        del buc  # bucket count is implied by E // deg
        return fused_tsage_mean(src_feat, dst_feat, dst_max_eid, dst_deg, deg,
                                self.w_cat, self.b_cat)


# ------------------------- Reference (pure JAX) -------------------------

def reference(module, src_feat, dst_feat, dst_max_eid, dst_deg, buc, deg):
    E, dim = src_feat.shape
    h_feat = jnp.cumsum(src_feat.reshape(buc, deg, dim), axis=1).reshape(E, dim)
    h_neigh = h_feat[dst_max_eid]
    h_neigh = h_neigh / (dst_deg + 1.0)[:, None]
    return (dst_feat @ module.w_self_t + module.b_self
            + h_neigh @ module.w_neigh_t + module.b_neigh)


# ------------------------- Main -------------------------

if __name__ == "__main__":
    key = jax.random.PRNGKey(0)
    k_mod, k_src, k_dst = jax.random.split(key, 3)

    buc, deg, dim, out = 8, 8, 32, 32      # E = 64 edges (toy sizes)
    E = buc * deg

    module = FastTSAGEConvMean(dim, out, k_mod)

    src_feat = jax.random.normal(k_src, (E, dim), jnp.float32)
    dst_feat = jax.random.normal(k_dst, (E, dim), jnp.float32)
    # Each dst bucket has `deg` time-sorted contiguous edges; each edge gathers
    # the prefix aggregation up to (and including) itself, and dst_deg counts
    # the valid temporal neighbors seen so far (synthetic graph bookkeeping).
    eids = jnp.arange(E, dtype=jnp.int32)
    dst_max_eid = eids                                  # within-bucket gather
    dst_deg = (eids % deg).astype(jnp.float32)          # mean_cof = pos + 1

    rst = module(src_feat, dst_feat, dst_max_eid, dst_deg, buc, deg)
    rst = jax.block_until_ready(rst)

    ref = reference(module, src_feat, dst_feat, dst_max_eid, dst_deg, buc, deg)
    np.testing.assert_allclose(np.asarray(rst), np.asarray(ref),
                               rtol=1e-5, atol=1e-4)
    print("KERNEL_OK")
</pallas_src>

<mosaic_0001>
module attributes {stable_mosaic.version = 11 : i64} {
  func.func @_fused_sage_kernel(%arg0: i32, %arg1: memref<16x8xf32, #tpu.memory_space<vmem>>, %arg2: memref<16x32xf32, #tpu.memory_space<vmem>>, %arg3: memref<16x32xf32, #tpu.memory_space<vmem>>, %arg4: memref<64x128xf32, #tpu.memory_space<vmem>>, %arg5: memref<1x128xf32, #tpu.memory_space<vmem>>, %arg6: memref<16x128xf32, #tpu.memory_space<vmem>>) attributes {dimension_semantics = [#tpu.dimension_semantics<parallel>], iteration_bounds = array<i64: 4>, scalar_prefetch = 0 : i64, scratch_operands = 0 : i64, tpu.core_type = #tpu.core_type<tc>, window_params = [{transform_indices = @transform_0, window_bounds = array<i64: 16, 8>}, {transform_indices = @transform_1, window_bounds = array<i64: 16, 32>}, {transform_indices = @transform_2, window_bounds = array<i64: 16, 32>}, {pipeline_mode = #tpu.pipeline_mode<synchronous>, transform_indices = @transform_3, window_bounds = array<i64: 64, 128>}, {pipeline_mode = #tpu.pipeline_mode<synchronous>, transform_indices = @transform_4, window_bounds = array<i64: 1, 128>}, {transform_indices = @transform_5, window_bounds = array<i64: 16, 128>}]} {
    %c0 = arith.constant 0 : index
    %c0_0 = arith.constant 0 : index
    %0 = vector.load %arg1[%c0, %c0_0] : memref<16x8xf32, #tpu.memory_space<vmem>>, vector<16x1xf32>
    %1 = arith.fptosi %0 : vector<16x1xf32> to vector<16x1xi32>
    %c0_1 = arith.constant 0 : index
    %c1 = arith.constant 1 : index
    %2 = vector.load %arg1[%c0_1, %c1] : memref<16x8xf32, #tpu.memory_space<vmem>>, vector<16x1xf32>
    %3 = arith.fptosi %2 : vector<16x1xf32> to vector<16x1xi32>
    %c0_2 = arith.constant 0 : index
    %c2 = arith.constant 2 : index
    %4 = vector.load %arg1[%c0_2, %c2] : memref<16x8xf32, #tpu.memory_space<vmem>>, vector<16x1xf32>
    %5 = tpu.iota {dimensions = array<i32: 1>} : vector<16x16xi32>
    %6 = vector.broadcast %1 : vector<16x1xi32> to vector<16x16xi32>
    %7 = arith.subi %5, %6 : vector<16x16xi32>
    %8 = vector.broadcast %3 : vector<16x1xi32> to vector<16x16xi32>
    %9 = arith.cmpi ule, %7, %8 : vector<16x16xi32>
    %cst = arith.constant 0.000000e+00 : f32
    %10 = vector.shape_cast %4 : vector<16x1xf32> to vector<16x1xf32>
    %11 = vector.broadcast %10 : vector<16x1xf32> to vector<16x16xf32>
    %12 = vector.broadcast %cst : f32 to vector<16x16xf32>
    %13 = arith.select %9, %11, %12 : vector<16x16xi1>, vector<16x16xf32>
    %c0_3 = arith.constant 0 : index
    %c0_4 = arith.constant 0 : index
    %14 = vector.load %arg2[%c0_3, %c0_4] : memref<16x32xf32, #tpu.memory_space<vmem>>, vector<16x32xf32>
    %cst_5 = arith.constant dense<0.000000e+00> : vector<16x32xf32>
    %15 = tpu.matmul %13, %14, %cst_5 {dimension_numbers = #tpu.dot_dimension_numbers<[1], [0], [0], [1], [0, 0, 1, 1], [], []>} : vector<16x16xf32>, vector<16x32xf32>, vector<16x32xf32> -> vector<16x32xf32>
    %c0_6 = arith.constant 0 : index
    %c0_7 = arith.constant 0 : index
    %16 = vector.load %arg3[%c0_6, %c0_7] : memref<16x32xf32, #tpu.memory_space<vmem>>, vector<16x32xf32>
    %c0_8 = arith.constant 0 : index
    %c0_9 = arith.constant 0 : index
    %17 = vector.load %arg4[%c0_8, %c0_9] : memref<64x128xf32, #tpu.memory_space<vmem>>, vector<32x128xf32>
    %cst_10 = arith.constant dense<0.000000e+00> : vector<16x128xf32>
    %18 = tpu.matmul %16, %17, %cst_10 {dimension_numbers = #tpu.dot_dimension_numbers<[1], [0], [0], [1], [0, 0, 1, 1], [], []>} : vector<16x32xf32>, vector<32x128xf32>, vector<16x128xf32> -> vector<16x128xf32>
    %c32 = arith.constant 32 : index
    %c0_11 = arith.constant 0 : index
    %19 = vector.load %arg4[%c32, %c0_11] : memref<64x128xf32, #tpu.memory_space<vmem>>, vector<32x128xf32>
    %cst_12 = arith.constant dense<0.000000e+00> : vector<16x128xf32>
    %20 = tpu.matmul %15, %19, %cst_12 {dimension_numbers = #tpu.dot_dimension_numbers<[1], [0], [0], [1], [0, 0, 1, 1], [], []>} : vector<16x32xf32>, vector<32x128xf32>, vector<16x128xf32> -> vector<16x128xf32>
    %21 = arith.addf %18, %20 : vector<16x128xf32>
    %c0_13 = arith.constant 0 : index
    %c0_14 = arith.constant 0 : index
    %22 = vector.load %arg5[%c0_13, %c0_14] : memref<1x128xf32, #tpu.memory_space<vmem>>, vector<1x128xf32>
    %23 = vector.broadcast %22 : vector<1x128xf32> to vector<16x128xf32>
    %24 = arith.addf %21, %23 : vector<16x128xf32>
    %c0_15 = arith.constant 0 : index
    %c0_16 = arith.constant 0 : index
    %25 = vector.load %arg6[%c0_15, %c0_16] : memref<16x128xf32, #tpu.memory_space<vmem>>, vector<16x128xf32>
    tpu.vector_store %arg6[%c0_15, %c0_16], %24 {strides = array<i32>} : memref<16x128xf32, #tpu.memory_space<vmem>>, vector<16x128xf32>,
    return
  }
  func.func @transform_0(%arg0: i32) -> (i32, i32) {
    %c0_i32 = arith.constant 0 : i32
    %c0_i32_0 = arith.constant 0 : i32
    return %arg0, %c0_i32 : i32, i32
  }
  func.func @transform_1(%arg0: i32) -> (i32, i32) {
    %c0_i32 = arith.constant 0 : i32
    %c0_i32_0 = arith.constant 0 : i32
    return %arg0, %c0_i32 : i32, i32
  }
  func.func @transform_2(%arg0: i32) -> (i32, i32) {
    %c0_i32 = arith.constant 0 : i32
    %c0_i32_0 = arith.constant 0 : i32
    return %arg0, %c0_i32 : i32, i32
  }
  func.func @transform_3(%arg0: i32) -> (i32, i32) {
    %c0_i32 = arith.constant 0 : i32
    %c0_i32_0 = arith.constant 0 : i32
    %c0_i32_1 = arith.constant 0 : i32
    return %c0_i32, %c0_i32_0 : i32, i32
  }
  func.func @transform_4(%arg0: i32) -> (i32, i32) {
    %c0_i32 = arith.constant 0 : i32
    %c0_i32_0 = arith.constant 0 : i32
    %c0_i32_1 = arith.constant 0 : i32
    return %c0_i32, %c0_i32_0 : i32, i32
  }
  func.func @transform_5(%arg0: i32) -> (i32, i32) {
    %c0_i32 = arith.constant 0 : i32
    %c0_i32_0 = arith.constant 0 : i32
    return %arg0, %c0_i32 : i32, i32
  }
}

</mosaic_0001>

<bundles_post_ra>
// kernel: tpu_custom_call.1
= control target key start
LH: loop header
LB: loop body
LE: loop exit
PB: predicated region body
PF: predicated region fallthrough
CT: control target
= control target key end

     0   :  { %10 = vsyncpa [#allocation3], 0  ;;  %s1055_s0 = inlined_call_operand.vmem [shape: f32[64,8], index: 0, kind: input, shape index: {}]   ;;  %s1056_s1 = inlined_call_operand.vmem [shape: f32[64,32], index: 1, kind: input, shape index: {}]   ;;  %s1057_s2 = inlined_call_operand.vmem [shape: f32[64,32], index: 2, kind: input, shape index: {}]   ;;  %s1058_s3 = inlined_call_operand.vmem [shape: f32[64,128], index: 3, kind: input, shape index: {}]   ;;  %s1059_s4 = inlined_call_operand.vmem [shape: f32[1,128], index: 4, kind: input, shape index: {}]   ;;  %s1060_s5 = inlined_call_operand.hbm [shape: f32[64,128], index: 5, kind: output, shape index: {}]  }
   0x1   :  { %12 = vsyncpa [#allocation3 + $0x1], 0  ;;  %s915_s18 = smov 0   ;;  %s917_s19 = smov 0  }
   0x2   :  { %s919_s20 = smov 0   ;;  %s921_s21 = smov 0  }
   0x3 LB: > { %s936_s22 = sadd.s32 4294967295, %s877_s21   ;;  %s672_s23 = sadd.s32 4294967294, %s877_s21   ;;  %s877_s21 = sphi %s921_s21, %s1066_s21   ;;  %s873_s20 = sphi %s919_s20, %s1065_s20   ;;  %s869_s19 = sphi %s917_s19, %s1064_s19   ;;  %s865_s18 = sphi %s915_s18, %s1063_s18  }
   0x4   : > { %s940_s24 = sadd.s32 1, %s877_s21   ;;  %s145_s25 = sadd.s32 1, %s873_s20 }
   0x5   : > { %s142_s26 = ssub.s32 %s877_s21, %s940_s24  ;;  %p155_p0 = scmp.ne.s32.totalorder %s873_s20, %s869_s19 }
   0x6   : > { %p143_p1 = scmp.eq.s32.totalorder %s142_s26, 0  ;;  %p156_p2 = scmp.eq.s32.totalorder %s936_s22, 3 }
   0x7   : > { %p161_p3 = scmp.ne.s32.totalorder %s869_s19, %s865_s18  ;;  %p162_p4 = scmp.eq.s32.totalorder %s672_s23, 3 }
   0x8   : > { %s951_s27 = scalar_select %p143_p1, %s873_s20, %s145_s25  }
   0x9   : > { %p953_p5 = por %p156_p2, %p155_p0  ;;  %p957_p6 = por %p162_p4, %p161_p3 }
   0xa   : > { %p675_p7 = scmp.ge.s32.totalorder %s877_s21, 1  ;;  %p213_p8 = scmp.lt.s32.totalorder %s877_s21, 5 }
   0xc   : > { %p214_p9 = pnand %p675_p7, %p213_p8 }
   0xd   : > { %s677_s30 = sshll.u32 (!%p214_p9), %s936_s22, 1  ;;  %v879_v0 = vmov (!%p214_p9), 1   ;;  %v880_v1 = vmov (!%p214_p9), 0   ;;  %v881_v11 = vmov (!%p214_p9), 2   ;;  %v390_v12 = vld [vmem:[%s1058_s3] sm:$0xff] (!%p214_p9)  ;;  %v391_v13 = vld [vmem:[%s1058_s3 + $0x8] sm:$0xff] (!%p214_p9)  ;;  %v274_v21 = vlaneseq (!%p214_p9) }
   0xe   : > { %217 = sbr.rel (%p214_p9) target bundleno = 614 (0x266), region = 40  ;;  %812 = vset.pattern.permute.xlu1 (!%p214_p9), %v879_v0  ;;  %811 = vset.pattern.permute.xlu0 (!%p214_p9), %v880_v1  ;;  %p252_p10 = scmp.lt.s32.totalorder (!%p214_p9), %s677_s30, 7  ;;  %v394_v14 = vld [vmem:[%s1058_s3 + $0x20] sm:$0xff] (!%p214_p9)  ;;  %v753_v15 = vpack.c.bf16 (!%p214_p9), %v391_v13, %v390_v12  ;;  %v395_v16 = vld [vmem:[%s1058_s3 + $0x28] sm:$0xff] (!%p214_p9)  ;;  %v392_v17 = vld [vmem:[%s1058_s3 + $0x10] sm:$0xff] (!%p214_p9)  ;;  %vm306_vm0 = vcmask (!%p214_p9), 130048  }
   0xf   : > { %v393_v18 = vld [vmem:[%s1058_s3 + $0x18] sm:$0xff] (!%p214_p9)  ;;  %v745_v19 = vpack.c.bf16 (!%p214_p9), %v395_v16, %v394_v14  ;;  %v275_v24 = vand.u32 (!%p214_p9), 127, %v274_v21  ;;  %v396_v29 = vld [vmem:[%s1058_s3 + $0x30] sm:$0xff] (!%p214_p9)  ;;  %vm398_vm3 = vcmask (!%p214_p9), 261120   ;;  %s248_s17 = sand.u32 (!%p214_p9), 1, %s869_s19   ;;  %s695_s7 = sshll.u32 (!%p214_p9), %s936_s22, 8 }
  0x10   : > { %v757_v20 = vpack.c.bf16 (!%p214_p9), %v393_v18, %v392_v17  ;;  %754 = vmatprep.subr.bf16.mxu1 (!%p214_p9), %v753_v15  ;;  %v397_v30 = vld [vmem:[%s1058_s3 + $0x38] sm:$0xff] (!%p214_p9)  ;;  %s676_s23 = sshll.u32 (!%p214_p9), %s248_s17, 4  ;;  %v689_v43 = vld [vmem:[%s1059_s4] ss:$0 sm:$0xff] (!%p214_p9)  ;;  %s1012_s10 = scalar_lea.hbm (!%p214_p9), %s1060_s5, %s695_s7 }
  0x11   : > { %756 = vmatpush3.bf16.msra.mxu1 (!%p214_p9), %v753_v15  ;;  %v749_v35 = vpack.c.bf16 (!%p214_p9), %v397_v30, %v396_v29  ;;  %s1014_s11 = scalar_lea.sflag (!%p214_p9), [#allocation3], %s248_s17 }
  0x12   : > { %758 = vmatprep.subr.bf16.mxu1 (!%p214_p9), %v757_v20 }
  0x15   : > { %s1068_s30 = smov (!%p252_p10, %s677_s30), 7  ;;  %760 = vmatpush3.bf16.msra.mxu1 %v757_v20 }
  0x16   : > { %s964_s6 = sshll.u32 %s1068_s30, 3 }
  0x17   : > { %s255_s9 = scalar_lea.vmem %s1055_s0, %s964_s6  ;;  %s261_s12 = scalar_lea.vmem %s1056_s1, %s964_s6 }
  0x18   : > { %v270_v2 = vld [vmem:[%s255_s9] sm:$0xff]  ;;  %v271_v3 = vld [vmem:[%s255_s9 + $0x8] sm:$0xff]  ;;  %s267_s16 = scalar_lea.vmem %s1057_s2, %s964_s6  ;;  %s250_s6 = scalar_lea.vmem [#allocation2], %s676_s23 }
  0x19   : > { %v763_v4 = vtrunc.f32 %v270_v2  ;;  %v765_v5 = vtrunc.f32 %v271_v3  ;;  %v304_v8 = vld [vmem:[%s261_s12] sm:$0xff]  ;;  %v305_v9 = vld [vmem:[%s261_s12 + $0x8] sm:$0xff]  ;;  %s586_s30 = sshll.u32 %s250_s6, 4  ;;  %s882_s12 = smov [#allocation2]   ;;  %s1007_s30 = int_to_ptr.vmem [resolvable:$true] %s586_s30 }
  0x1a   : > { %v741_v10 = vpack.c.bf16 %v305_v9, %v304_v8  ;;  %v388_v36 = vld [vmem:[%s267_s16] sm:$0xff]  ;;  %v389_v37 = vld [vmem:[%s267_s16 + $0x8] sm:$0xff]  ;;  %s815_s22 = scalar_lea.vmem %s1007_s30, 256  ;;  %s819_s13 = sshll.u32 %s882_s12, 4  ;;  %s820_s13 = int_to_ptr.vmem [resolvable:$false] %s819_s13 }
  0x1b   : > { %v764_v6 = vcvt.f32.s32 %v763_v4  ;;  %v766_v7 = vcvt.f32.s32 %v765_v5  ;;  %738 = vmatprep.mubr.msk.f32.mxu1 %vm398_vm3, %v388_v36  ;;  %p816_p11 = scmp.ne.s32.totalorder %s1007_s30, %s815_s22  ;;  %s821_s14 = scalar_lea.vmem %s820_s13, 512 }
  0x1c   : > { %742 = vmatprep.subr.bf16.mxu0 %v741_v10  ;;  %739 = vmatmul.mubr.msk.f32.vlgmr.msra.gmra.mrb[0].mxu1 %vm398_vm3, %v389_v37  ;;  %p822_p0 = scmp.lt.s32.totalorder %s1007_s30, %s820_s13  ;;  %p823_p1 = scmp.lt.s32.totalorder %s821_s14, %s815_s22 }
  0x1d   : > { %285 = vperm.xlu1 %812, %v764_v6   ;;  %277 = vperm.xlu0 %811, %v764_v6   ;;  %p817_p12 = pnand %p816_p11, %p953_p5 }
  0x1e   : > { %744 = vmatpush3.bf16.msra.mxu0 %v741_v10  ;;  %p824_p2 = por %p823_p1, %p822_p0 }
  0x1f   : > { %746 = vmatprep.subr.bf16.mxu0 %v745_v19  ;;  %p818_p13 = pneg %p817_p12 }
  0x21   : > { %288 = vperm.xlu1 %812, %v766_v7   ;;  %280 = vperm.xlu0 %811, %v766_v7   ;;  %p825_p3 = pnand %p824_p2, %p818_p13 }
  0x25   : > { %814 = vset.pattern.permute.xlu1 %v881_v11  ;;  %813 = vset.pattern.permute.xlu0 %v881_v11 }
  0x26   : > { %299 = vperm.xlu1 %814, %v271_v3   ;;  %294 = vperm.xlu0 %813, %v270_v2  }
  0x9c   : > { %v286_v22 = vpop.permute.xlu1 %285  ;;  %v278_v23 = vpop.permute.xlu0 %277 }
  0x9d   : > { %v282_v27 = vsub.s32 %v275_v24, %v278_v23 }
  0x9f   : > { %vm290_vm2 = vcmp.le.u32.totalorder %v282_v27, %v286_v22 }
  0xa0   : > { %v289_v25 = vpop.permute.xlu1 %288  ;;  %v281_v26 = vpop.permute.xlu0 %280 }
  0xa1   : > { %v283_v28 = vsub.s32 %v275_v24, %v281_v26 }
  0xa3   : > { %vm291_vm1 = vcmp.le.u32.totalorder %v283_v28, %v289_v25 }
  0xa5   : > { %v300_v31 = vpop.permute.xlu1 %299  ;;  %v295_v32 = vpop.permute.xlu0 %294 }
  0xa6   : > { %v303_v33 = vsel %vm291_vm1, %v300_v31, 0.0  ;;  %v302_v34 = vsel %vm290_vm2, %v295_v32, 0.0 }
  0xa7   : > { %716 = vmatprep.mubr.msk.f32.mxu0 %vm306_vm0, %v302_v34 }
  0xa8   : > { %717 = vmatmul.mubr.msk.f32.vlgmr.msra.gmra.mrb[0].mxu0 %vm306_vm0, %v303_v33 }
  0xa9   : > { %748 = vmatpush3.bf16.msra.mxu0 %v745_v19 }
  0xaa   : > { %750 = vmatprep.subr.bf16.mxu0 %v749_v35 }
  0xad   : > { %752 = vmatpush3.bf16.msra.mxu0 %v749_v35 }
  0xef   : > { %v740_v40 = vpop.f32.mrb[0].mxu1 }
  0xf0   : > { %v552_v41 = vpop.f32.mrb[1].mxu1 }
 0x17b   : > { %v718_v38 = vpop.f32.mrb[0].mxu0 }
 0x17c   : > { %v379_v39 = vpop.f32.mrb[1].mxu0 }
 0x17d   : > { %727 = vmatprep.mubr.msk.f32.mxu0 %vm398_vm3, %v379_v39 }
 0x17e   : > { %728 = vmatmul.mubr.msk.f32.vlgmr.msra.gmra.mrb[2].mxu0 %vm398_vm3, %v718_v38 }
 0x251   : > { %v729_v42 = vpop.f32.mrb[2].mxu0 }
 0x252   : > { %v558_v44 = vadd.f32 %v740_v40, %v729_v42  ;;  %v471_v45 = vpop.f32.mrb[3].mxu0 }
 0x253   : > { %v553_v46 = vadd.f32 %v552_v41, %v471_v45 }
 0x254   : > { %v569_v47 = vadd.f32 %v689_v43, %v558_v44 }
 0x255   : > { %v568_v48 = vadd.f32 %v689_v43, %v553_v46 }
 0x256   : > { %571 = vst [vmem:[%s250_s6 + $0x8] sm:$0xff] %v569_v47 }
 0x257   : > { %570 = vst [vmem:[%s250_s6] sm:$0xff] %v568_v48 }
 0x258   : > { %828 = shalt.err (!%p825_p3)
}
 0x259   : > { %s829_s15 = scalar_lea.hbm %s1012_s10, 256  ;;  %s833_s23 = scalar_lea.hbm %s1060_s5, 1024 }
 0x25a   : > { %p830_p4 = scmp.ne.s32.totalorder %s1012_s10, %s829_s15  ;;  %p834_p9 = scmp.lt.u32.totalorder %s1012_s10, %s1060_s5 }
 0x25b   : > { %p835_p10 = scmp.lt.u32.totalorder %s833_s23, %s829_s15  ;;  %p837_p12 = scmp.lt.u32.totalorder %s829_s15, %s1012_s10 }
 0x25c   : > { %p831_p7 = pnand %p830_p4, %p953_p5 }
 0x25d   : > { %p836_p11 = por %p835_p10, %p834_p9 }
 0x25e   : > { %p832_p8 = pneg %p831_p7 }
 0x25f   : > { %p838_p13 = por %p837_p12, %p836_p11 }
 0x261   : > { %p839_p0 = pnand %p838_p13, %p832_p8 }
 0x263   : > { %842 = shalt.err (!%p839_p0)
}
 0x264   : > { %s883_s6 = smov 128   ;;  %s884_s7 = smov 8  }
 0x265   : > { %767 = dma.vmem_to_hbm [thread:$0]  (%p953_p5), %s1007_s30, 256, %s1012_s10, %s1014_s11, %s883_s6, %s883_s6, %s884_s7  }
 0x266 PF: > { %p773_p1 = scmp.ge.s32.totalorder %s877_s21, 2  ;;  %s601_s8 = sand.u32 1, %s865_s18  }
 0x267   : > { %s602_s9 = scalar_lea.sflag [#allocation3], %s601_s8 }
 0x268   : > { %p770_p2 = pnand %p773_p1, %p957_p6 }
 0x26a   : > { %860 = dma.done.wait (!%p770_p2), %s602_s9, 256  }
 0x26b   : > { %862 = vsyncadd (!%p770_p2), %s602_s9, 4294967040  ;;  %p15_p3 = scmp.ge.s32.totalorder %s940_s24, 6   ;;  %s1063_s18 = smov %s869_s19 }
 0x26c   : > { %s1064_s19 = smov %s873_s20  ;;  %s1065_s20 = smov %s951_s27 }
 0x26d   : > { %s1066_s21 = smov %s940_s24  ;;  %17 = sbr.rel (!%p15_p3) target bundleno = 3 (0x3), region = 81 }
 0x274   :  { %607 = vsyncpa [#allocation3], 1 }
 0x275   :  { %609 = vsyncpa [#allocation3 + $0x1], 1 }

</bundles_post_ra>
